<compile_context>
chip_gen: v7x
topology: tpu7x:2x2x1
jax: 0.10.0
libtpu: 0.0.40
codegen_flags: <defaults>
</compile_context>

<pallas_src>
import functools

import jax
import jax.numpy as jnp
import numpy as np
from jax.experimental import pallas as pl
from jax.experimental.pallas import tpu as pltpu

_EPS = 1e-8  # torch.cosine_similarity default eps


def _round_up(x, m):
    return ((x + m - 1) // m) * m


def _cosine_metric_kernel(scale, x1_ref, x2_ref, o_ref, w1_ref):
    j = pl.program_id(1)

    x1 = x1_ref[...]  # [tm, D], native dtype (bf16 ok for the MXU)
    x2 = x2_ref[...]  # [tn, D]

    # All pairwise dots on the MXU; contract last dims (no x2.T materialized).
    dots = jax.lax.dot_general(
        x1, x2,
        dimension_numbers=(((1,), (1,)), ((), ())),
        preferred_element_type=jnp.float32)                    # [tm, tn]

    # Squared row-norms of the x1 tile depend only on the i grid index:
    # compute once per i (at j == 0) and cache in VMEM scratch.
    @pl.when(j == 0)
    def _():
        x1f = x1.astype(jnp.float32)
        w1_ref[...] = jnp.sum(x1f * x1f, axis=-1, keepdims=True)   # [tm, 1]

    x2f = x2.astype(jnp.float32)
    w2 = jnp.sum(x2f * x2f, axis=-1, keepdims=True)                # [tn, 1]

    # clamp(w1 * w2, eps^2) then rsqrt == clamp(||x1||*||x2||, eps) then 1/x.
    denom_sq = jnp.maximum(w1_ref[...] * w2.T, _EPS * _EPS)        # [tm, tn]
    o_ref[...] = (scale * dots * jax.lax.rsqrt(denom_sq)).astype(o_ref.dtype)


def cosine_metric(x1, x2, scale, *, tm=256, tn=256):
    """scale * cosine_similarity(x1[:, None, :], x2[None, :, :], dim=-1)."""
    n1, d = x1.shape
    n2, d2 = x2.shape
    assert d == d2, "feature dims must match"

    # Adapt tile sizes to small problems while keeping sublane/lane alignment
    # (second-to-last block dim multiple of 8, output lane dim multiple of 128).
    tm = min(tm, _round_up(n1, 8))
    tn = min(tn, _round_up(n2, 128))

    n1p = _round_up(n1, tm)
    n2p = _round_up(n2, tn)

    # Zero-pad rows so the grid divides evenly; padded rows have zero norm,
    # the eps^2 clamp keeps them finite, and they are sliced away below.
    if n1p != n1:
        x1 = jnp.pad(x1, ((0, n1p - n1), (0, 0)))
    if n2p != n2:
        x2 = jnp.pad(x2, ((0, n2p - n2), (0, 0)))

    grid = (n1p // tm, n2p // tn)
    kernel = functools.partial(_cosine_metric_kernel, float(scale))

    # TODO(synk): for very large D, add a K (feature) grid axis with an f32
    # accumulator + pl.when init/finalize; D is kept resident here.
    out = pl.pallas_call(
        kernel,
        out_shape=jax.ShapeDtypeStruct((n1p, n2p), x1.dtype),
        grid_spec=pltpu.PrefetchScalarGridSpec(
            num_scalar_prefetch=0,
            grid=grid,
            in_specs=[
                pl.BlockSpec((tm, d), lambda i, j: (i, 0)),
                pl.BlockSpec((tn, d), lambda i, j: (j, 0)),
            ],
            out_specs=pl.BlockSpec((tm, tn), lambda i, j: (i, j)),
            scratch_shapes=[pltpu.VMEM((tm, 1), jnp.float32)],
        ),
        compiler_params=pltpu.CompilerParams(
            # i is parallel (megacore-shardable); j is sequential so the
            # w1 scratch written at j == 0 is valid for the rest of the row.
            dimension_semantics=("parallel", "arbitrary"),
            # Tile budget (2 inputs x 2 buffers + lane-dense output tile)
            # stays comfortably under 32 MiB on v5e/v6e/v7x.
            vmem_limit_bytes=32 * 1024 * 1024,
        ),
    )(x1, x2)

    return out[:n1, :n2]


if __name__ == "__main__":
    key = jax.random.PRNGKey(0)
    k1, k2 = jax.random.split(key)

    # Small shapes implied by the forward: x1 [N1, D], x2 [N2, D]
    N1, N2, D = 8, 16, 32
    scale = 10.0

    x1 = jax.random.normal(k1, (N1, D), dtype=jnp.float32)
    x2 = jax.random.normal(k2, (N2, D), dtype=jnp.float32)

    out = jax.block_until_ready(cosine_metric(x1, x2, scale))

    # Pure-JAX reference (same semantics as torch.cosine_similarity).
    dots = x1 @ x2.T
    n1 = jnp.linalg.norm(x1, axis=-1, keepdims=True)
    n2 = jnp.linalg.norm(x2, axis=-1, keepdims=True)
    ref = scale * dots / jnp.maximum(n1 * n2.T, _EPS)

    np.testing.assert_allclose(np.asarray(out), np.asarray(ref),
                               rtol=1e-5, atol=1e-5)
    print("KERNEL_OK")
</pallas_src>

<mosaic_0001>
module attributes {stable_mosaic.version = 11 : i64} {
  func.func @_cosine_metric_kernel(%arg0: i32, %arg1: i32, %arg2: memref<8x32xf32, #tpu.memory_space<vmem>>, %arg3: memref<128x32xf32, #tpu.memory_space<vmem>>, %arg4: memref<8x128xf32, #tpu.memory_space<vmem>>, %arg5: memref<8x1xf32, #tpu.memory_space<vmem>>) attributes {dimension_semantics = [#tpu.dimension_semantics<parallel>, #tpu.dimension_semantics<arbitrary>], iteration_bounds = array<i64: 1, 1>, scalar_prefetch = 0 : i64, scratch_operands = 1 : i64, tpu.core_type = #tpu.core_type<tc>, window_params = [{transform_indices = @transform_0, window_bounds = array<i64: 8, 32>}, {transform_indices = @transform_1, window_bounds = array<i64: 128, 32>}, {transform_indices = @transform_2, window_bounds = array<i64: 8, 128>}]} {
    %c0 = arith.constant 0 : index
    %c0_0 = arith.constant 0 : index
    %0 = vector.load %arg2[%c0, %c0_0] : memref<8x32xf32, #tpu.memory_space<vmem>>, vector<8x32xf32>
    %c0_1 = arith.constant 0 : index
    %c0_2 = arith.constant 0 : index
    %1 = vector.load %arg3[%c0_1, %c0_2] : memref<128x32xf32, #tpu.memory_space<vmem>>, vector<128x32xf32>
    %cst = arith.constant dense<0.000000e+00> : vector<8x128xf32>
    %2 = tpu.matmul %0, %1, %cst {dimension_numbers = #tpu.dot_dimension_numbers<[1], [1], [0], [0], [0, 0, 1, 0], [], []>} : vector<8x32xf32>, vector<128x32xf32>, vector<8x128xf32> -> vector<8x128xf32>
    %c0_i32 = arith.constant 0 : i32
    %3 = arith.cmpi eq, %arg1, %c0_i32 : i32
    %4 = arith.extui %3 : i1 to i32
    %c0_i32_3 = arith.constant 0 : i32
    %5 = arith.cmpi ne, %4, %c0_i32_3 : i32
    scf.if %5 {
      %21 = arith.mulf %0, %0 : vector<8x32xf32>
      %cst_11 = arith.constant dense<0.000000e+00> : vector<8xf32>
      %22 = vector.multi_reduction <add>, %21, %cst_11 [1] : vector<8x32xf32> to vector<8xf32>
      %23 = vector.shape_cast %22 : vector<8xf32> to vector<8x1xf32>
      %c0_12 = arith.constant 0 : index
      %c0_13 = arith.constant 0 : index
      %24 = vector.load %arg5[%c0_12, %c0_13] : memref<8x1xf32, #tpu.memory_space<vmem>>, vector<8x1xf32>
      tpu.vector_store %arg5[%c0_12, %c0_13], %23 {strides = array<i32>} : memref<8x1xf32, #tpu.memory_space<vmem>>, vector<8x1xf32>,
    } else {
    }
    %6 = arith.mulf %1, %1 : vector<128x32xf32>
    %cst_4 = arith.constant dense<0.000000e+00> : vector<128xf32>
    %7 = vector.multi_reduction <add>, %6, %cst_4 [1] : vector<128x32xf32> to vector<128xf32>
    %8 = vector.shape_cast %7 : vector<128xf32> to vector<128x1xf32>
    %c0_5 = arith.constant 0 : index
    %c0_6 = arith.constant 0 : index
    %9 = vector.load %arg5[%c0_5, %c0_6] : memref<8x1xf32, #tpu.memory_space<vmem>>, vector<8x1xf32>
    %10 = tpu.transpose %8, [1, 0] : vector<128x1xf32> -> vector<1x128xf32>
    %11 = vector.broadcast %9 : vector<8x1xf32> to vector<8x128xf32>
    %12 = vector.broadcast %10 : vector<1x128xf32> to vector<8x128xf32>
    %13 = arith.mulf %11, %12 : vector<8x128xf32>
    %cst_7 = arith.constant 1.000000e-16 : f32
    %14 = vector.broadcast %cst_7 : f32 to vector<8x128xf32>
    %15 = arith.maximumf %13, %14 : vector<8x128xf32>
    %cst_8 = arith.constant 1.000000e+01 : f32
    %16 = vector.broadcast %cst_8 : f32 to vector<8x128xf32>
    %17 = arith.mulf %16, %2 : vector<8x128xf32>
    %18 = math.rsqrt %15 : vector<8x128xf32>
    %19 = arith.mulf %17, %18 : vector<8x128xf32>
    %c0_9 = arith.constant 0 : index
    %c0_10 = arith.constant 0 : index
    %20 = vector.load %arg4[%c0_9, %c0_10] : memref<8x128xf32, #tpu.memory_space<vmem>>, vector<8x128xf32>
    tpu.vector_store %arg4[%c0_9, %c0_10], %19 {strides = array<i32>} : memref<8x128xf32, #tpu.memory_space<vmem>>, vector<8x128xf32>,
    return
  }
  func.func @transform_0(%arg0: i32, %arg1: i32) -> (i32, i32) {
    %c0_i32 = arith.constant 0 : i32
    %c0_i32_0 = arith.constant 0 : i32
    return %arg0, %c0_i32 : i32, i32
  }
  func.func @transform_1(%arg0: i32, %arg1: i32) -> (i32, i32) {
    %c0_i32 = arith.constant 0 : i32
    %c0_i32_0 = arith.constant 0 : i32
    return %arg1, %c0_i32 : i32, i32
  }
  func.func @transform_2(%arg0: i32, %arg1: i32) -> (i32, i32) {
    %c0_i32 = arith.constant 0 : i32
    return %arg0, %arg1 : i32, i32
  }
}

</mosaic_0001>

<bundles_post_ra>
// kernel: tpu_custom_call.1
= control target key start
LH: loop header
LB: loop body
LE: loop exit
PB: predicated region body
PF: predicated region fallthrough
CT: control target
= control target key end

     0   :  { %vm29_vm0 = vcmask 261120   ;;  %v421_v8 = vmov 0.0|0.0   ;;  %vm422_vm2 = vmmov 0   ;;  %v423_v15 = vmov 0.0   ;;  %s559_s0 = inlined_call_operand.vmem [shape: f32[8,32], index: 0, kind: input, shape index: {}]   ;;  %s560_s1 = inlined_call_operand.vmem [shape: f32[128,32], index: 1, kind: input, shape index: {}]   ;;  %s561_s2 = inlined_call_operand.hbm [shape: f32[8,128], index: 2, kind: output, shape index: {}]  }
   0x1   :  { %v444_v0 = vld [vmem:[%s559_s0] sm:$0xff]  ;;  %v14_v2 = vld [vmem:[%s560_s1 + $0x8] sm:$0xff]  ;;  %v15_v7 = vld [vmem:[%s560_s1 + $0x10] sm:$0xff]  ;;  %356 = vmatprep.subr.bf16.mxu0 %v421_v8  ;;  %353 = vmatprep.mubr.msk.f32.mxu0 %vm422_vm2, %v423_v15 }
   0x2   :  { %v13_v1 = vld [vmem:[%s560_s1] sm:$0xff]  ;;  %v155_v3 = vmul.f32 %v444_v0, %v444_v0  ;;  %v162_v5 = vmul.f32 %v14_v2, %v14_v2  ;;  %vm460_vm1 = vmpackc.low %vm29_vm0, %vm29_vm0  ;;  %v163_v10 = vmul.f32 %v15_v7, %v15_v7  ;;  %v16_v11 = vld [vmem:[%s560_s1 + $0x18] sm:$0xff] }
   0x3   :  { %v161_v4 = vmul.f32 %v13_v1, %v13_v1  ;;  %v357_v6 = vpack.c.bf16 %v14_v2, %v13_v1  ;;  %v17_v12 = vld [vmem:[%s560_s1 + $0x20] sm:$0xff]  ;;  %v164_v18 = vmul.f32 %v16_v11, %v16_v11  ;;  %v18_v20 = vld [vmem:[%s560_s1 + $0x28] sm:$0xff]  ;;  %v19_v21 = vld [vmem:[%s560_s1 + $0x30] sm:$0xff] }
   0x4   :  { %v156_v13 = vsel %vm29_vm0, %v155_v3, 0.0  ;;  %v180_v14 = vsel %vm29_vm0, %v162_v5, 0.0  ;;  %v183_v17 = vsel %vm29_vm0, %v163_v10, 0.0  ;;  %v165_v19 = vmul.f32 %v17_v12, %v17_v12 }
   0x5   :  { %359 = vmatpush3.bf16.xpose.msk.msra.mxu0 %vm460_vm1, %v357_v6  ;;  %157 = vadd.xlane.f32.xlu0 %v156_v13  ;;  %v177_v16 = vsel %vm29_vm0, %v161_v4, 0.0 }
   0x6   :  { %181 = vadd.xlane.f32.xlu1 %v180_v14  ;;  %360 = vmatprep.subr.bf16.mxu0 %v421_v8 }
   0x7   :  { %7 = vsyncpa [#allocation4], 0  ;;  %v361_v22 = vpack.c.bf16 %v16_v11, %v15_v7  ;;  %v186_v23 = vsel %vm29_vm0, %v164_v18, 0.0  ;;  %v189_v24 = vsel %vm29_vm0, %v165_v19, 0.0  ;;  %v166_v25 = vmul.f32 %v18_v20, %v18_v20  ;;  %v20_v27 = vld [vmem:[%s560_s1 + $0x38] sm:$0xff]  ;;  %v21_v28 = vld [vmem:[%s560_s1 + $0x40] sm:$0xff] }
   0x8   :  { %v167_v26 = vmul.f32 %v19_v21, %v19_v21  ;;  %v168_v31 = vmul.f32 %v20_v27, %v20_v27  ;;  %v169_v32 = vmul.f32 %v21_v28, %v21_v28  ;;  %v22_v33 = vld [vmem:[%s560_s1 + $0x48] sm:$0xff]  ;;  %v23_v34 = vld [vmem:[%s560_s1 + $0x50] sm:$0xff]  ;;  %v365_v35 = vpack.c.bf16 %v18_v20, %v17_v12  ;;  %v24_v40 = vld [vmem:[%s560_s1 + $0x58] sm:$0xff] }
   0x9   :  { %178 = vadd.xlane.f32.xlu0 %v177_v16  ;;  %v192_v29 = vsel %vm29_vm0, %v166_v25, 0.0  ;;  %v170_v38 = vmul.f32 %v22_v33, %v22_v33  ;;  %v171_v39 = vmul.f32 %v23_v34, %v23_v34  ;;  %v25_v41 = vld [vmem:[%s560_s1 + $0x60] sm:$0xff]  ;;  %v172_v44 = vmul.f32 %v24_v40, %v24_v40  ;;  %v26_v46 = vld [vmem:[%s560_s1 + $0x68] sm:$0xff]  ;;  %v27_v48 = vld [vmem:[%s560_s1 + $0x70] sm:$0xff] }
   0xa   :  { %184 = vadd.xlane.f32.xlu1 %v183_v17  ;;  %v195_v30 = vsel %vm29_vm0, %v167_v26, 0.0  ;;  %v198_v36 = vsel %vm29_vm0, %v168_v31, 0.0  ;;  %v201_v37 = vsel %vm29_vm0, %v169_v32, 0.0  ;;  %v173_v45 = vmul.f32 %v25_v41, %v25_v41  ;;  %v28_v54 = vld [vmem:[%s560_s1 + $0x78] sm:$0xff]  ;;  %s425_s1 = smov [#allocation3]  }
   0xb   :  { %v204_v42 = vsel %vm29_vm0, %v170_v38, 0.0  ;;  %v207_v43 = vsel %vm29_vm0, %v171_v39, 0.0  ;;  %v369_v47 = vpack.c.bf16 %v20_v27, %v19_v21  ;;  %v424_v49 = vmov 0   ;;  %s279_s14 = sshll.u32 %s425_s1, 4  ;;  %s280_s14 = int_to_ptr.vmem [resolvable:$true] %s279_s14 }
   0xc   :  { %393 = vset.pattern.permute.xlu1 %v424_v49  ;;  %v210_v50 = vsel %vm29_vm0, %v172_v44, 0.0  ;;  %v174_v51 = vmul.f32 %v26_v46, %v26_v46  ;;  %v213_v52 = vsel %vm29_vm0, %v173_v45, 0.0  ;;  %v175_v53 = vmul.f32 %v27_v48, %v27_v48  ;;  %s397_s15 = scalar_lea.vmem %s280_s14, 128  ;;  %p402_p1 = scmp.lt.s32.totalorder %s280_s14, %s280_s14 }
   0xd   :  { %363 = vmatpush3.bf16.xpose.msk.msra.mxu0 %vm460_vm1, %v361_v22  ;;  %187 = vadd.xlane.f32.xlu0 %v186_v23  ;;  %v176_v56 = vmul.f32 %v28_v54, %v28_v54  ;;  %v373_v58 = vpack.c.bf16 %v22_v33, %v21_v28  ;;  %v377_v60 = vpack.c.bf16 %v24_v40, %v23_v34  ;;  %vm159_vm3 = vcmask 7168   ;;  %p398_p0 = scmp.ne.s32.totalorder %s280_s14, %s397_s15  ;;  %p403_p2 = scmp.lt.s32.totalorder %s397_s15, %s397_s15 }
   0xe   :  { %190 = vadd.xlane.f32.xlu1 %v189_v24  ;;  %364 = vmatprep.subr.bf16.mxu0 %v421_v8  ;;  %v216_v55 = vsel %vm29_vm0, %v174_v51, 0.0  ;;  %v219_v57 = vsel %vm29_vm0, %v175_v53, 0.0  ;;  %v381_v61 = vpack.c.bf16 %v26_v46, %v25_v41  ;;  %v385_v62 = vpack.c.bf16 %v28_v54, %v27_v48 }
   0xf   :  { %v222_v59 = vsel %vm29_vm0, %v176_v56, 0.0  ;;  %v263_v17 = vlaneseq  ;;  %p404_p3 = por %p403_p2, %p402_p1 }
  0x11   :  { %193 = vadd.xlane.f32.xlu0 %v192_v29  ;;  %v264_v18 = vshrl.u32 %v263_v17, 7  ;;  %p405_p4 = pnand %p404_p3, %p398_p0 }
  0x12   :  { %196 = vadd.xlane.f32.xlu1 %v195_v30 }
  0x13   :  { %v265_v19 = vsub.s32 0, %v264_v18 }
  0x15   :  { %367 = vmatpush3.bf16.xpose.msk.msra.mxu0 %vm460_vm1, %v365_v35  ;;  %199 = vadd.xlane.f32.xlu0 %v198_v36 }
  0x16   :  { %202 = vadd.xlane.f32.xlu1 %v201_v37  ;;  %368 = vmatprep.subr.bf16.mxu0 %v421_v8 }
  0x19   :  { %205 = vadd.xlane.f32.xlu0 %v204_v42 }
  0x1a   :  { %208 = vadd.xlane.f32.xlu1 %v207_v43 }
  0x1d   :  { %371 = vmatpush3.bf16.xpose.msk.msra.mxu0 %vm460_vm1, %v369_v47  ;;  %211 = vadd.xlane.f32.xlu0 %v210_v50 }
  0x1e   :  { %372 = vmatprep.subr.bf16.mxu0 %v421_v8  ;;  %214 = vadd.xlane.f32.xlu1 %v213_v52 }
  0x21   :  { %217 = vadd.xlane.f32.xlu0 %v216_v55 }
  0x22   :  { %220 = vadd.xlane.f32.xlu1 %v219_v57 }
  0x25   :  { %375 = vmatpush3.bf16.xpose.msk.msra.mxu0 %vm460_vm1, %v373_v58  ;;  %223 = vadd.xlane.f32.xlu0 %v222_v59 }
  0x26   :  { %376 = vmatprep.subr.bf16.mxu0 %v421_v8 }
  0x2d   :  { %379 = vmatpush3.bf16.xpose.msk.msra.mxu0 %vm460_vm1, %v377_v60 }
  0x2e   :  { %380 = vmatprep.subr.bf16.mxu0 %v421_v8 }
  0x35   :  { %383 = vmatpush3.bf16.xpose.msk.msra.mxu0 %vm460_vm1, %v381_v61 }
  0x36   :  { %384 = vmatprep.subr.bf16.mxu0 %v421_v8 }
  0x3d   :  { %387 = vmatpush3.bf16.xpose.msk.msra.mxu0 %vm460_vm1, %v385_v62 }
  0x44   :  { %354 = vmatmul.mubr.msk.f32.vlgmr.msra.gmra.mrb[0].mxu0 %vm29_vm0, %v444_v0 }
  0x92   :  { %v158_v63 = vpop.xlane.xlu0 %157 }
  0x93   :  { %160 = vst.msk [vmem:[#allocation2] sm:$0xff] %vm159_vm3, %v158_v63  ;;  %v182_v2 = vpop.xlane.xlu1 %181 }
  0x96   :  { %v179_v1 = vpop.xlane.xlu0 %178 }
  0x97   :  { %226 = vxpose.xlu0.b32.start [1/16] (narrow) %v179_v1, 8  ;;  %v185_v4 = vpop.xlane.xlu1 %184 }
  0x9a   :  { %v225_v3 = vld [vmem:[#allocation2] sm:$0xff]  ;;  %v188_v5 = vpop.xlane.xlu0 %187 }
  0x9b   :  { %260 = vperm.xlu1 %393, %v225_v3   ;;  %227 = vxpose.xlu0.b32.cont [2/16] (narrow) %v182_v2, 8  ;;  %v191_v6 = vpop.xlane.xlu1 %190 }
  0x9e   :  { %v194_v7 = vpop.xlane.xlu0 %193 }
  0x9f   :  { %228 = vxpose.xlu0.b32.cont [3/16] (narrow) %v185_v4, 8  ;;  %v197_v8 = vpop.xlane.xlu1 %196 }
  0xa2   :  { %v200_v0 = vpop.xlane.xlu0 %199 }
  0xa3   :  { %229 = vxpose.xlu0.b32.cont [4/16] (narrow) %v188_v5, 8  ;;  %v203_v9 = vpop.xlane.xlu1 %202 }
  0xa6   :  { %v206_v10 = vpop.xlane.xlu0 %205 }
  0xa7   :  { %230 = vxpose.xlu0.b32.cont [5/16] (narrow) %v191_v6, 8  ;;  %v209_v11 = vpop.xlane.xlu1 %208 }
  0xaa   :  { %v212_v12 = vpop.xlane.xlu0 %211 }
  0xab   :  { %231 = vxpose.xlu0.b32.cont [6/16] (narrow) %v194_v7, 8  ;;  %v215_v13 = vpop.xlane.xlu1 %214 }
  0xae   :  { %v218_v14 = vpop.xlane.xlu0 %217 }
  0xaf   :  { %232 = vxpose.xlu0.b32.cont [7/16] (narrow) %v197_v8, 8  ;;  %v221_v15 = vpop.xlane.xlu1 %220 }
  0xb2   :  { %v224_v16 = vpop.xlane.xlu0 %223 }
  0xb3   :  { %233 = vxpose.xlu0.b32.cont [8/16] (narrow) %v200_v0, 8 }
  0xb7   :  { %234 = vxpose.xlu0.b32.cont [9/16] (narrow) %v203_v9, 8 }
  0xbb   :  { %235 = vxpose.xlu0.b32.cont [10/16] (narrow) %v206_v10, 8 }
  0xbf   :  { %236 = vxpose.xlu0.b32.cont [11/16] (narrow) %v209_v11, 8 }
  0xc3   :  { %237 = vxpose.xlu0.b32.cont [12/16] (narrow) %v212_v12, 8 }
  0xc7   :  { %238 = vxpose.xlu0.b32.cont [13/16] (narrow) %v215_v13, 8 }
  0xcb   :  { %239 = vxpose.xlu0.b32.cont [14/16] (narrow) %v218_v14, 8 }
  0xcf   :  { %240 = vxpose.xlu0.b32.cont [15/16] (narrow) %v221_v15, 8 }
  0xd3   :  { %241 = vxpose.xlu0.b32.end [16/16] (narrow) %v224_v16, 8 }
  0xfc   :  { %394 = vset.pattern.permute.xlu0 %v424_v49 }
 0x117   :  { %v147_v20 = vpop.f32.mrb[0].mxu0  ;;  %v242_v21 = vpop.trf.xlu0 }
 0x118   :  { %v355_v22 = vpop.f32.mrb[1].mxu0  ;;  %v266_v23 = vrot.slane %v242_v21, %v265_v19  ;;  %v269_v27 = vmul.f32 10.0, %v147_v20 }
 0x11a   :  { %v261_v24 = vpop.permute.xlu1 %260 }
 0x11b   :  { %v267_v25 = vmul.f32 %v266_v23, %v261_v24 }
 0x11d   :  { %v268_v26 = vmax.f32 %v267_v25, 1e-16 }
 0x11f   :  { %395 = vrsqrt.f32 %v268_v26 }
 0x129   :  { %v396_v28 = vpop.eup %395 }
 0x12a   :  { %v271_v29 = vmul.f32 %v396_v28, %v269_v27 }
 0x12c   :  { %272 = vst [vmem:[#allocation3] sm:$0xff] %v271_v29 }
 0x12d   :  { %408 = shalt.err (!%p405_p4)
}
 0x12e   :  { %s409_s17 = scalar_lea.hbm %s561_s2, 128 }
 0x12f   :  { %p410_p5 = scmp.ne.s32.totalorder %s561_s2, %s409_s17  ;;  %p413_p6 = scmp.lt.u32.totalorder %s409_s17, %s561_s2 }
 0x131   :  { %p415_p7 = pnand %p413_p6, %p410_p5 }
 0x133   :  { %418 = shalt.err (!%p415_p7)
}
 0x134   :  { %282 = dma.vmem_to_hbm [thread:$0]  %s280_s14, 128, %s561_s2, [#allocation4]  }
 0x135   :  { %419 = dma.done.wait [#allocation4], 128  }
 0x136   :  { %420 = vsyncadd [#allocation4], 4294967168 }
 0x137   :  { %286 = vsyncpa [#allocation4], 1 }

</bundles_post_ra>
